<compile_context>
chip_gen: v7x
topology: tpu7x:2x2x1
jax: 0.10.0
libtpu: 0.0.40
codegen_flags: <defaults>
</compile_context>

<pallas_src>
import functools

import jax
import jax.numpy as jnp
from jax.experimental import pallas as pl
from jax.experimental.pallas import tpu as pltpu


LANES = 128


# ----------------------------- mask construction (glue, plain JAX) -----------

def sample_mask_indices(input_dim, hidden_dim):
    # "simple=True" branch of the PyTorch helper.
    indices = jnp.linspace(1.0, float(input_dim), num=hidden_dim, dtype=jnp.float32)
    return jnp.round(indices)


def create_mask(input_dim, observed_dim, hidden_dim, num_layers, permutation,
                output_dim_multiplier):
    var_index = jnp.zeros((input_dim,), dtype=jnp.float32).at[permutation].set(
        jnp.arange(input_dim, dtype=jnp.float32))
    input_indices = jnp.concatenate(
        [jnp.zeros((observed_dim,), dtype=jnp.float32), 1.0 + var_index])
    hidden_indices = [sample_mask_indices(input_dim, hidden_dim)
                      for _ in range(num_layers)]
    output_indices = jnp.tile(var_index + 1.0, output_dim_multiplier)

    mask_skip = (output_indices[:, None] > input_indices[None, :]).astype(jnp.float32)
    masks = [(hidden_indices[0][:, None] > input_indices[None, :]).astype(jnp.float32)]
    for i in range(1, num_layers):
        masks.append((hidden_indices[i][:, None] >=
                      hidden_indices[i - 1][None, :]).astype(jnp.float32))
    masks.append((output_indices[:, None] >=
                  hidden_indices[-1][None, :]).astype(jnp.float32))
    return masks, mask_skip


# ----------------------------- parameter init (glue, plain JAX) --------------

def init_linear(key, out_features, in_features, with_bias=True):
    # Mimic nn.Linear default init: U(-1/sqrt(fan_in), 1/sqrt(fan_in)).
    kw, kb = jax.random.split(key)
    bound = 1.0 / jnp.sqrt(jnp.float32(in_features))
    w = jax.random.uniform(kw, (out_features, in_features), jnp.float32,
                           minval=-bound, maxval=bound)
    if with_bias:
        b = jax.random.uniform(kb, (out_features,), jnp.float32,
                               minval=-bound, maxval=bound)
    else:
        b = None
    return w, b


# ----------------------------- Pallas kernel ---------------------------------

def _arnn_kernel(num_hidden, has_skip,
                 x_ref, w_hid_ref, b_hid_ref, w_out_ref, b_out_ref, out_ref):
    """One batch tile of the MADE forward pass (all feature dims 128-padded).

    x_ref     : (tb, Dh)                       input tile (compute dtype)
    w_hid_ref : (num_hidden, Dh, Dh)           pre-masked, pre-transposed hidden weights
    b_hid_ref : (num_hidden, 1, Dh)            hidden biases (f32)
    w_out_ref : (2*Dh or Dh, Do)               [W_out.T ; W_skip.T] merged output weights
    b_out_ref : (1, Do)                        output bias (f32)
    out_ref   : (tb, Do)                       lane-dense output tile (f32)
    """
    x = x_ref[...]
    h = x
    for li in range(num_hidden):                       # static Python unroll
        h = jnp.dot(h, w_hid_ref[li], preferred_element_type=jnp.float32)
        h = jnp.maximum(h + b_hid_ref[li], 0.0)        # bias + ReLU in f32
        h = h.astype(x.dtype)                          # back to MXU operand dtype
    if has_skip:
        # Output and skip matmuls merged: concat sits on a 128-lane boundary.
        h = jnp.concatenate([h, x], axis=-1)           # (tb, 2*Dh)
    out = jnp.dot(h, w_out_ref[...], preferred_element_type=jnp.float32)
    out_ref[...] = (out + b_out_ref[...]).astype(out_ref.dtype)


# ----------------------------- packing / wrapper ------------------------------

def _round_up(x, m):
    return ((x + m - 1) // m) * m


def _num_tensorcores():
    # v7x has 2 TensorCores per chip; v5e/v6e have 1.  Best-effort detection.
    try:
        kind = jax.devices()[0].device_kind.lower()
        if "v7" in kind:
            return 2
    except Exception:
        pass
    return 1


def pack_arnn_params(params, masks, mask_skip, *, skip_connections,
                     compute_dtype=jnp.float32):
    """Fold masks into weights, transpose to (in, out), zero-pad to 128 lanes,
    and merge the skip weights into the output weight slot."""
    num_hidden = len(masks) - 1
    hidden_dim = masks[0].shape[0]
    input_dim = masks[0].shape[1]
    out_dim = masks[-1].shape[0]

    dh = _round_up(max(input_dim, hidden_dim), LANES)
    do = _round_up(out_dim, LANES)

    w_hid = jnp.zeros((num_hidden, dh, dh), compute_dtype)
    b_hid = jnp.zeros((num_hidden, 1, dh), jnp.float32)
    for i in range(num_hidden):
        w, b = params[i]
        folded = (w * masks[i]).T                       # (in_features, out_features)
        w_hid = w_hid.at[i, :folded.shape[0], :folded.shape[1]].set(
            folded.astype(compute_dtype))
        b_hid = b_hid.at[i, 0, :b.shape[0]].set(b.astype(jnp.float32))

    w_last, b_last = params[num_hidden]
    folded_out = (w_last * masks[num_hidden]).T         # (hidden_dim, out_dim)
    k_out = 2 * dh if skip_connections else dh
    w_out = jnp.zeros((k_out, do), compute_dtype)
    w_out = w_out.at[:folded_out.shape[0], :folded_out.shape[1]].set(
        folded_out.astype(compute_dtype))
    if skip_connections:
        folded_skip = (params[-1][0] * mask_skip).T     # (input_dim, out_dim)
        w_out = w_out.at[dh:dh + folded_skip.shape[0], :folded_skip.shape[1]].set(
            folded_skip.astype(compute_dtype))
    b_out = jnp.zeros((1, do), jnp.float32).at[0, :b_last.shape[0]].set(
        b_last.astype(jnp.float32))

    dims = dict(num_hidden=num_hidden, input_dim=input_dim, out_dim=out_dim,
                dh=dh, do=do)
    return w_hid, b_hid, w_out, b_out, dims


def autoregressive_nn_forward(x, params, masks, mask_skip, *,
                              skip_connections, tile_batch=512,
                              compute_dtype=jnp.float32):
    """params: list of (w, b) for each MaskedLinear; optional wskip at params[-1].

    compute_dtype=jnp.bfloat16 halves HBM traffic on v6e/v7x (accumulation
    stays f32 via preferred_element_type); keep f32 for bit-tight checks.
    """
    batch, input_dim = x.shape
    w_hid, b_hid, w_out, b_out, dims = pack_arnn_params(
        params, masks, mask_skip, skip_connections=skip_connections,
        compute_dtype=compute_dtype)
    num_hidden, dh, do, out_dim = (dims["num_hidden"], dims["dh"],
                                   dims["do"], dims["out_dim"])

    # ----- batch tiling: one big tile on single-TC parts, >=2 tiles on v7x ----
    padded8 = _round_up(batch, 8)
    n_cores = _num_tensorcores()
    tb = min(tile_batch, padded8)
    if n_cores > 1:
        tb = min(tb, _round_up(pl.cdiv(padded8, n_cores), 8))
    tb = max(tb, 8)
    padded = _round_up(batch, tb)
    grid = (pl.cdiv(padded, tb),)

    # ----- pad x to (padded, dh): rows independent, padded lanes/rows are 0 ---
    x_p = jnp.zeros((padded, dh), compute_dtype)
    x_p = x_p.at[:batch, :input_dim].set(x.astype(compute_dtype))

    kernel = functools.partial(_arnn_kernel, num_hidden, skip_connections)
    out = pl.pallas_call(
        kernel,
        out_shape=jax.ShapeDtypeStruct((padded, do), jnp.float32),
        grid=grid,
        in_specs=[
            pl.BlockSpec((tb, dh), lambda i: (i, 0)),          # x batch tile
            pl.BlockSpec(w_hid.shape, lambda i: (0, 0, 0)),    # resident weights
            pl.BlockSpec(b_hid.shape, lambda i: (0, 0, 0)),    # resident biases
            pl.BlockSpec(w_out.shape, lambda i: (0, 0)),       # resident out+skip weights
            pl.BlockSpec(b_out.shape, lambda i: (0, 0)),       # resident out bias
        ],
        out_specs=pl.BlockSpec((tb, do), lambda i: (i, 0)),    # lane-dense output
        compiler_params=pltpu.CompilerParams(
            dimension_semantics=("parallel",)),                # feed both TCs on v7x
    )(x_p, w_hid, b_hid, w_out, b_out)
    return out[:batch, :out_dim]


# ----------------------------- reference (plain JAX) --------------------------

def reference_forward(x, params, masks, mask_skip, *, skip_connections):
    num_hidden_layers = len(masks) - 1
    h = x
    for i in range(num_hidden_layers):
        w, b = params[i]
        h = jnp.maximum(h @ (w * masks[i]).T + b, 0.0)
    w, b = params[num_hidden_layers]
    h = h @ (w * masks[num_hidden_layers]).T + b
    if skip_connections:
        wskip = params[-1][0]
        h = h + x @ (wskip * mask_skip).T
    return h


# ----------------------------- main -------------------------------------------

if __name__ == "__main__":
    input_dim = 8
    hidden_dim = 32
    output_dim_multiplier = 2
    num_layers = 2
    skip_connections = True
    batch = 200   # deliberately not a multiple of 8/tile -> exercises padding

    key = jax.random.PRNGKey(0)
    k_perm, k_x, *k_layers = jax.random.split(key, 2 + num_layers + 2)

    permutation = jax.random.permutation(k_perm, input_dim)
    masks, mask_skip = create_mask(
        input_dim=input_dim, observed_dim=0, hidden_dim=hidden_dim,
        num_layers=num_layers, permutation=permutation,
        output_dim_multiplier=output_dim_multiplier)

    # Layers: [Linear(input_dim, hidden), Linear(hidden, hidden) x (num_layers-1),
    #          Linear(hidden, input_dim * output_dim_multiplier)]
    params = [init_linear(k_layers[0], hidden_dim, input_dim)]
    for i in range(1, num_layers):
        params.append(init_linear(k_layers[i], hidden_dim, hidden_dim))
    params.append(init_linear(k_layers[num_layers],
                              input_dim * output_dim_multiplier, hidden_dim))
    if skip_connections:
        wskip, _ = init_linear(k_layers[num_layers + 1],
                               input_dim * output_dim_multiplier, input_dim,
                               with_bias=False)
        params.append((wskip, None))

    x = jax.random.normal(k_x, (batch, input_dim), dtype=jnp.float32)

    # compute_dtype=jnp.bfloat16 is the one-line switch for v6e/v7x (relax the
    # allclose tolerance to ~1e-2 if adopted); f32 here keeps the check tight.
    out = autoregressive_nn_forward(x, params, masks, mask_skip,
                                    skip_connections=skip_connections,
                                    compute_dtype=jnp.float32)
    out = jax.block_until_ready(out)

    ref = reference_forward(x, params, masks, mask_skip,
                            skip_connections=skip_connections)
    assert out.shape == (batch, input_dim * output_dim_multiplier)
    assert jnp.allclose(out, ref, atol=1e-5, rtol=1e-5)

    print("KERNEL_OK")
</pallas_src>

<mosaic_0001>
module attributes {stable_mosaic.version = 11 : i64} {
  func.func @_arnn_kernel(%arg0: i32, %arg1: memref<200x128xf32, #tpu.memory_space<vmem>>, %arg2: memref<2x128x128xf32, #tpu.memory_space<vmem>>, %arg3: memref<2x1x128xf32, #tpu.memory_space<vmem>>, %arg4: memref<256x128xf32, #tpu.memory_space<vmem>>, %arg5: memref<1x128xf32, #tpu.memory_space<vmem>>, %arg6: memref<200x128xf32, #tpu.memory_space<vmem>>) attributes {dimension_semantics = [#tpu.dimension_semantics<parallel>], iteration_bounds = array<i64: 1>, scalar_prefetch = 0 : i64, scratch_operands = 0 : i64, tpu.core_type = #tpu.core_type<tc>, window_params = [{transform_indices = @transform_0, window_bounds = array<i64: 200, 128>}, {pipeline_mode = #tpu.pipeline_mode<synchronous>, transform_indices = @transform_1, window_bounds = array<i64: 2, 128, 128>}, {pipeline_mode = #tpu.pipeline_mode<synchronous>, transform_indices = @transform_2, window_bounds = array<i64: 2, 1, 128>}, {pipeline_mode = #tpu.pipeline_mode<synchronous>, transform_indices = @transform_3, window_bounds = array<i64: 256, 128>}, {pipeline_mode = #tpu.pipeline_mode<synchronous>, transform_indices = @transform_4, window_bounds = array<i64: 1, 128>}, {transform_indices = @transform_5, window_bounds = array<i64: 200, 128>}]} {
    %c0 = arith.constant 0 : index
    %c0_0 = arith.constant 0 : index
    %0 = vector.load %arg1[%c0, %c0_0] : memref<200x128xf32, #tpu.memory_space<vmem>>, vector<200x128xf32>
    %c0_1 = arith.constant 0 : index
    %c0_2 = arith.constant 0 : index
    %c0_3 = arith.constant 0 : index
    %1 = vector.load %arg2[%c0_1, %c0_2, %c0_3] : memref<2x128x128xf32, #tpu.memory_space<vmem>>, vector<1x128x128xf32>
    %2 = vector.shape_cast %1 : vector<1x128x128xf32> to vector<128x128xf32>
    %cst = arith.constant dense<0.000000e+00> : vector<200x128xf32>
    %3 = tpu.matmul %0, %2, %cst {dimension_numbers = #tpu.dot_dimension_numbers<[1], [0], [0], [1], [0, 0, 1, 1], [], []>} : vector<200x128xf32>, vector<128x128xf32>, vector<200x128xf32> -> vector<200x128xf32>
    %c0_4 = arith.constant 0 : index
    %c0_5 = arith.constant 0 : index
    %c0_6 = arith.constant 0 : index
    %4 = vector.load %arg3[%c0_4, %c0_5, %c0_6] : memref<2x1x128xf32, #tpu.memory_space<vmem>>, vector<1x1x128xf32>
    %5 = vector.shape_cast %4 : vector<1x1x128xf32> to vector<1x128xf32>
    %6 = vector.broadcast %5 : vector<1x128xf32> to vector<200x128xf32>
    %7 = arith.addf %3, %6 : vector<200x128xf32>
    %cst_7 = arith.constant 0.000000e+00 : f32
    %8 = vector.broadcast %cst_7 : f32 to vector<200x128xf32>
    %9 = arith.maximumf %7, %8 : vector<200x128xf32>
    %c1 = arith.constant 1 : index
    %c0_8 = arith.constant 0 : index
    %c0_9 = arith.constant 0 : index
    %10 = vector.load %arg2[%c1, %c0_8, %c0_9] : memref<2x128x128xf32, #tpu.memory_space<vmem>>, vector<1x128x128xf32>
    %11 = vector.shape_cast %10 : vector<1x128x128xf32> to vector<128x128xf32>
    %cst_10 = arith.constant dense<0.000000e+00> : vector<200x128xf32>
    %12 = tpu.matmul %9, %11, %cst_10 {dimension_numbers = #tpu.dot_dimension_numbers<[1], [0], [0], [1], [0, 0, 1, 1], [], []>} : vector<200x128xf32>, vector<128x128xf32>, vector<200x128xf32> -> vector<200x128xf32>
    %c1_11 = arith.constant 1 : index
    %c0_12 = arith.constant 0 : index
    %c0_13 = arith.constant 0 : index
    %13 = vector.load %arg3[%c1_11, %c0_12, %c0_13] : memref<2x1x128xf32, #tpu.memory_space<vmem>>, vector<1x1x128xf32>
    %14 = vector.shape_cast %13 : vector<1x1x128xf32> to vector<1x128xf32>
    %15 = vector.broadcast %14 : vector<1x128xf32> to vector<200x128xf32>
    %16 = arith.addf %12, %15 : vector<200x128xf32>
    %cst_14 = arith.constant 0.000000e+00 : f32
    %17 = vector.broadcast %cst_14 : f32 to vector<200x128xf32>
    %18 = arith.maximumf %16, %17 : vector<200x128xf32>
    %19 = tpu.concatenate %18, %0 in 1 : vector<200x128xf32>, vector<200x128xf32> -> vector<200x256xf32>
    %c0_15 = arith.constant 0 : index
    %c0_16 = arith.constant 0 : index
    %20 = vector.load %arg4[%c0_15, %c0_16] : memref<256x128xf32, #tpu.memory_space<vmem>>, vector<256x128xf32>
    %cst_17 = arith.constant dense<0.000000e+00> : vector<200x128xf32>
    %21 = tpu.matmul %19, %20, %cst_17 {dimension_numbers = #tpu.dot_dimension_numbers<[1], [0], [0], [1], [0, 0, 1, 1], [], []>} : vector<200x256xf32>, vector<256x128xf32>, vector<200x128xf32> -> vector<200x128xf32>
    %c0_18 = arith.constant 0 : index
    %c0_19 = arith.constant 0 : index
    %22 = vector.load %arg5[%c0_18, %c0_19] : memref<1x128xf32, #tpu.memory_space<vmem>>, vector<1x128xf32>
    %23 = vector.broadcast %22 : vector<1x128xf32> to vector<200x128xf32>
    %24 = arith.addf %21, %23 : vector<200x128xf32>
    %c0_20 = arith.constant 0 : index
    %c0_21 = arith.constant 0 : index
    %25 = vector.load %arg6[%c0_20, %c0_21] : memref<200x128xf32, #tpu.memory_space<vmem>>, vector<200x128xf32>
    tpu.vector_store %arg6[%c0_20, %c0_21], %24 {strides = array<i32>} : memref<200x128xf32, #tpu.memory_space<vmem>>, vector<200x128xf32>,
    return
  }
  func.func @transform_0(%arg0: i32) -> (i32, i32) {
    %c0_i32 = arith.constant 0 : i32
    %c0_i32_0 = arith.constant 0 : i32
    return %arg0, %c0_i32 : i32, i32
  }
  func.func @transform_1(%arg0: i32) -> (i32, i32, i32) {
    %c0_i32 = arith.constant 0 : i32
    %c0_i32_0 = arith.constant 0 : i32
    %c0_i32_1 = arith.constant 0 : i32
    %c0_i32_2 = arith.constant 0 : i32
    return %c0_i32, %c0_i32_0, %c0_i32_1 : i32, i32, i32
  }
  func.func @transform_2(%arg0: i32) -> (i32, i32, i32) {
    %c0_i32 = arith.constant 0 : i32
    %c0_i32_0 = arith.constant 0 : i32
    %c0_i32_1 = arith.constant 0 : i32
    %c0_i32_2 = arith.constant 0 : i32
    return %c0_i32, %c0_i32_0, %c0_i32_1 : i32, i32, i32
  }
  func.func @transform_3(%arg0: i32) -> (i32, i32) {
    %c0_i32 = arith.constant 0 : i32
    %c0_i32_0 = arith.constant 0 : i32
    %c0_i32_1 = arith.constant 0 : i32
    return %c0_i32, %c0_i32_0 : i32, i32
  }
  func.func @transform_4(%arg0: i32) -> (i32, i32) {
    %c0_i32 = arith.constant 0 : i32
    %c0_i32_0 = arith.constant 0 : i32
    %c0_i32_1 = arith.constant 0 : i32
    return %c0_i32, %c0_i32_0 : i32, i32
  }
  func.func @transform_5(%arg0: i32) -> (i32, i32) {
    %c0_i32 = arith.constant 0 : i32
    %c0_i32_0 = arith.constant 0 : i32
    return %arg0, %c0_i32 : i32, i32
  }
}

</mosaic_0001>

<bundles_post_ra>
// kernel: tpu_custom_call.1
= control target key start
LH: loop header
LB: loop body
LE: loop exit
PB: predicated region body
PF: predicated region fallthrough
CT: control target
= control target key end

     0   :  { %10 = vsyncpa [#allocation3], 0  ;;  %s1864_s0 = inlined_call_operand.hbm [shape: f32[200,128], index: 0, kind: input, shape index: {}]   ;;  %s1865_s1 = inlined_call_operand.hbm [shape: f32[2,128,128], index: 1, kind: input, shape index: {}]   ;;  %s1866_s2 = inlined_call_operand.vmem [shape: f32[2,1,128], index: 2, kind: input, shape index: {}]   ;;  %s1867_s3 = inlined_call_operand.hbm [shape: f32[256,128], index: 3, kind: input, shape index: {}]   ;;  %s1868_s4 = inlined_call_operand.vmem [shape: f32[1,128], index: 4, kind: input, shape index: {}]   ;;  %s1869_s5 = inlined_call_operand.hbm [shape: f32[200,128], index: 5, kind: output, shape index: {}]  }
   0x1   :  { %11 = vsyncpa [#allocation6], 0 }
   0x2   :  { %12 = vsyncpa [#allocation4], 0  ;;  %s1368_s18 = smov [#allocation5]   ;;  %s1369_s20 = smov [#allocation2]  }
   0x3   :  { %s30_s19 = sshll.u32 %s1368_s18, 4  ;;  %s18_s21 = sshll.u32 %s1369_s20, 4  ;;  %s31_s19 = int_to_ptr.vmem [resolvable:$true] %s30_s19  ;;  %s1407_s21 = int_to_ptr.vmem [resolvable:$true] %s18_s21 }
   0x4   :  { %s1274_s24 = scalar_lea.hbm %s1865_s1, 4096 }
   0x5   :  { %p1275_p0 = scmp.ne.s32.totalorder %s1865_s1, %s1274_s24  ;;  %p1278_p1 = scmp.lt.u32.totalorder %s1274_s24, %s1865_s1 }
   0x7   :  { %p1280_p2 = pnand %p1278_p1, %p1275_p0 }
   0x9   :  { %1283 = shalt.err (!%p1280_p2)
}
   0xa   :  { %s1284_s29 = scalar_lea.vmem %s31_s19, 4096  ;;  %p1289_p4 = scmp.lt.s32.totalorder %s31_s19, %s31_s19 }
   0xb   :  { %p1285_p3 = scmp.ne.s32.totalorder %s31_s19, %s1284_s29  ;;  %p1290_p5 = scmp.lt.s32.totalorder %s1284_s29, %s1284_s29 }
   0xd   :  { %p1291_p6 = por %p1290_p5, %p1289_p4 }
   0xf   :  { %p1292_p7 = pnand %p1291_p6, %p1285_p3 }
  0x11   :  { %1295 = shalt.err (!%p1292_p7)
}
  0x12   :  { %s1370_s30 = smov 128   ;;  %s1371_s6 = smov 8  }
  0x13   :  { %36 = dma.hbm_to_vmem [thread:$0]  %s1865_s1, 4096, %s31_s19, [#allocation6], %s1370_s30, %s1370_s30, %s1371_s6  }
  0x14   :  { %s1296_s11 = scalar_lea.hbm %s1864_s0, 3200 }
  0x15   :  { %p1297_p8 = scmp.ne.s32.totalorder %s1864_s0, %s1296_s11  ;;  %p1300_p9 = scmp.lt.u32.totalorder %s1296_s11, %s1864_s0 }
  0x17   :  { %p1302_p10 = pnand %p1300_p9, %p1297_p8 }
  0x19   :  { %1305 = shalt.err (!%p1302_p10)
}
  0x1a   :  { %s1306_s16 = scalar_lea.vmem %s1407_s21, 3200  ;;  %p1311_p12 = scmp.lt.s32.totalorder %s1407_s21, %s1407_s21 }
  0x1b   :  { %p1307_p11 = scmp.ne.s32.totalorder %s1407_s21, %s1306_s16  ;;  %p1312_p13 = scmp.lt.s32.totalorder %s1306_s16, %s1306_s16 }
  0x1d   :  { %p1313_p0 = por %p1312_p13, %p1311_p12 }
  0x1f   :  { %p1314_p1 = pnand %p1313_p0, %p1307_p11 }
  0x21   :  { %1317 = shalt.err (!%p1314_p1)
}
  0x22   :  { %24 = dma.hbm_to_vmem [thread:$0]  %s1864_s0, 3200, %s1407_s21, [#allocation3], %s1370_s30, %s1370_s30, %s1371_s6  }
  0x23   :  { %s1372_s18 = smov [#allocation7]   ;;  %s1318_s23 = scalar_lea.hbm %s1867_s3, 4096 }
  0x24   :  { %s44_s19 = sshll.u32 %s1372_s18, 4  ;;  %p1319_p2 = scmp.ne.s32.totalorder %s1867_s3, %s1318_s23  ;;  %s45_s19 = int_to_ptr.vmem [resolvable:$true] %s44_s19 }
  0x25   :  { %p1322_p3 = scmp.lt.u32.totalorder %s1318_s23, %s1867_s3 }
  0x27   :  { %p1324_p4 = pnand %p1322_p3, %p1319_p2 }
  0x29   :  { %1327 = shalt.err (!%p1324_p4)
}
  0x2a   :  { %s1328_s28 = scalar_lea.vmem %s45_s19, 4096  ;;  %p1333_p6 = scmp.lt.s32.totalorder %s45_s19, %s45_s19 }
  0x2b   :  { %p1329_p5 = scmp.ne.s32.totalorder %s45_s19, %s1328_s28  ;;  %p1334_p7 = scmp.lt.s32.totalorder %s1328_s28, %s1328_s28 }
  0x2d   :  { %p1335_p8 = por %p1334_p7, %p1333_p6 }
  0x2f   :  { %p1336_p9 = pnand %p1335_p8, %p1329_p5 }
  0x31   :  { %1339 = shalt.err (!%p1336_p9)
}
  0x32   :  { %50 = dma.hbm_to_vmem [thread:$0]  %s1867_s3, 4096, %s45_s19, [#allocation6], %s1370_s30, %s1370_s30, %s1371_s6  }
  0x33   :  { %1362 = dma.done.wait [#allocation3], 3200  }
  0x34   :  { %1363 = vsyncadd [#allocation3], 4294964096 }
  0x35   :  { %1364 = dma.done.wait [#allocation6], 8192  }
  0x36   :  { %1365 = vsyncadd [#allocation6], 4294959104  ;;  %v1373_v0 = vmov 0.0|0.0   ;;  %vm1374_vm0 = vmmov 0   ;;  %v1375_v1 = vmov 0.0   ;;  %v87_v2 = vld [vmem:[#allocation5] sm:$0xff] }
  0x37   :  { %1137 = vmatprep.subr.bf16.mxu0 %v1373_v0  ;;  %955 = vmatprep.mubr.msk.f32.mxu0 %vm1374_vm0, %v1375_v1  ;;  %v88_v3 = vld [vmem:[#allocation5 + $0x8] sm:$0xff]  ;;  %v89_v4 = vld [vmem:[#allocation5 + $0x10] sm:$0xff]  ;;  %v90_v6 = vld [vmem:[#allocation5 + $0x18] sm:$0xff] }
  0x38   :  { %1161 = vmatprep.subr.bf16.mxu1 %v1373_v0  ;;  %1062 = vmatprep.mubr.msk.f32.mxu1 %vm1374_vm0, %v1375_v1  ;;  %v1138_v5 = vpack.c.bf16 %v88_v3, %v87_v2  ;;  %v1141_v7 = vpack.c.bf16 %v90_v6, %v89_v4  ;;  %v91_v8 = vld [vmem:[#allocation5 + $0x20] sm:$0xff]  ;;  %v92_v9 = vld [vmem:[#allocation5 + $0x28] sm:$0xff]  ;;  %v93_v11 = vld [vmem:[#allocation5 + $0x30] sm:$0xff] }
  0x39   :  { %v1144_v10 = vpack.c.bf16 %v92_v9, %v91_v8  ;;  %v94_v12 = vld [vmem:[#allocation5 + $0x38] sm:$0xff]  ;;  %v95_v14 = vld [vmem:[#allocation5 + $0x40] sm:$0xff]  ;;  %v96_v15 = vld [vmem:[#allocation5 + $0x48] sm:$0xff] }
  0x3a   :  { %1139 = vmatpush3.bf16.msra.mxu0 %v1138_v5  ;;  %v1147_v13 = vpack.c.bf16 %v94_v12, %v93_v11  ;;  %v326_v16 = vld [vmem:[#allocation5 + $0x80] sm:$0xff]  ;;  %v327_v17 = vld [vmem:[#allocation5 + $0x88] sm:$0xff]  ;;  %v328_v18 = vld [vmem:[#allocation5 + $0x90] sm:$0xff]  ;;  %v1150_v20 = vpack.c.bf16 %v96_v15, %v95_v14 }
  0x3b   :  { %1140 = vmatprep.subr.bf16.mxu0 %v1373_v0  ;;  %v329_v19 = vld [vmem:[#allocation5 + $0x98] sm:$0xff]  ;;  %v1162_v21 = vpack.c.bf16 %v327_v17, %v326_v16  ;;  %v97_v22 = vld [vmem:[#allocation5 + $0x50] sm:$0xff]  ;;  %v330_v25 = vld [vmem:[#allocation5 + $0xa0] sm:$0xff] }
  0x3c   :  { %v98_v23 = vld [vmem:[#allocation5 + $0x58] sm:$0xff]  ;;  %v1165_v24 = vpack.c.bf16 %v329_v19, %v328_v18  ;;  %v331_v26 = vld [vmem:[#allocation5 + $0xa8] sm:$0xff]  ;;  %v99_v28 = vld [vmem:[#allocation5 + $0x60] sm:$0xff] }
  0x3d   :  { %1163 = vmatpush3.bf16.msra.mxu1 %v1162_v21  ;;  %v1153_v27 = vpack.c.bf16 %v98_v23, %v97_v22  ;;  %v100_v29 = vld [vmem:[#allocation5 + $0x68] sm:$0xff]  ;;  %v1168_v30 = vpack.c.bf16 %v331_v26, %v330_v25  ;;  %v332_v31 = vld [vmem:[#allocation5 + $0xb0] sm:$0xff]  ;;  %v333_v32 = vld [vmem:[#allocation5 + $0xb8] sm:$0xff] }
  0x3e   :  { %1142 = vmatpush3.bf16.msra.mxu0 %v1141_v7  ;;  %1164 = vmatprep.subr.bf16.mxu1 %v1373_v0  ;;  %v1156_v33 = vpack.c.bf16 %v100_v29, %v99_v28  ;;  %v101_v34 = vld [vmem:[#allocation5 + $0x70] sm:$0xff]  ;;  %v102_v35 = vld [vmem:[#allocation5 + $0x78] sm:$0xff]  ;;  %v1171_v36 = vpack.c.bf16 %v333_v32, %v332_v31  ;;  %v334_v37 = vld [vmem:[#allocation5 + $0xc0] sm:$0xff] }
  0x3f   :  { %1143 = vmatprep.subr.bf16.mxu0 %v1373_v0  ;;  %v335_v38 = vld [vmem:[#allocation5 + $0xc8] sm:$0xff]  ;;  %v1159_v39 = vpack.c.bf16 %v102_v35, %v101_v34  ;;  %v336_v41 = vld [vmem:[#allocation5 + $0xd0] sm:$0xff]  ;;  %v337_v42 = vld [vmem:[#allocation5 + $0xd8] sm:$0xff] }
  0x40   :  { %v1174_v40 = vpack.c.bf16 %v335_v38, %v334_v37  ;;  %v1476_v43 = vld [vmem:[#allocation2] sm:$0xff]  ;;  %v1177_v44 = vpack.c.bf16 %v337_v42, %v336_v41  ;;  %v338_v45 = vld [vmem:[#allocation5 + $0xe0] sm:$0xff]  ;;  %v339_v46 = vld [vmem:[#allocation5 + $0xe8] sm:$0xff] }
  0x41   :  { %1166 = vmatpush3.bf16.msra.mxu1 %v1165_v24  ;;  %v1483_v47 = vld [vmem:[#allocation2 + $0x8] sm:$0xff]  ;;  %v1180_v48 = vpack.c.bf16 %v339_v46, %v338_v45  ;;  %v1489_v49 = vld [vmem:[#allocation2 + $0x10] sm:$0xff]  ;;  %v1495_v50 = vld [vmem:[#allocation2 + $0x18] sm:$0xff] }
  0x42   :  { %1145 = vmatpush3.bf16.msra.mxu0 %v1144_v10  ;;  %1167 = vmatprep.subr.bf16.mxu1 %v1373_v0  ;;  %v1500_v51 = vld [vmem:[#allocation2 + $0x20] sm:$0xff]  ;;  %v1505_v52 = vld [vmem:[#allocation2 + $0x28] sm:$0xff]  ;;  %v1510_v53 = vld [vmem:[#allocation2 + $0x30] sm:$0xff] }
  0x43   :  { %1146 = vmatprep.subr.bf16.mxu0 %v1373_v0  ;;  %v1515_v54 = vld [vmem:[#allocation2 + $0x38] sm:$0xff]  ;;  %v1520_v55 = vld [vmem:[#allocation2 + $0x40] sm:$0xff]  ;;  %v1525_v56 = vld [vmem:[#allocation2 + $0x48] sm:$0xff] }
  0x44   :  { %v1530_v57 = vld [vmem:[#allocation2 + $0x50] sm:$0xff]  ;;  %v1535_v58 = vld [vmem:[#allocation2 + $0x58] sm:$0xff]  ;;  %v1540_v59 = vld [vmem:[#allocation2 + $0x60] sm:$0xff] }
  0x45   :  { %1169 = vmatpush3.bf16.msra.mxu1 %v1168_v30  ;;  %v1545_v60 = vld [vmem:[#allocation2 + $0x68] sm:$0xff]  ;;  %v1550_v61 = vld [vmem:[#allocation2 + $0x70] sm:$0xff]  ;;  %v1555_v62 = vld [vmem:[#allocation2 + $0x78] sm:$0xff] }
  0x46   :  { %1148 = vmatpush3.bf16.msra.mxu0 %v1147_v13  ;;  %1170 = vmatprep.subr.bf16.mxu1 %v1373_v0  ;;  %v1560_v63 = vld [vmem:[#allocation2 + $0x80] sm:$0xff]  ;;  %v1565_v2 = vld [vmem:[#allocation2 + $0x88] sm:$0xff]  ;;  %v1570_v3 = vld [vmem:[#allocation2 + $0x90] sm:$0xff] }
  0x47   :  { %1149 = vmatprep.subr.bf16.mxu0 %v1373_v0  ;;  %v1575_v4 = vld [vmem:[#allocation2 + $0x98] sm:$0xff]  ;;  %v1580_v5 = vld [vmem:[#allocation2 + $0xa0] sm:$0xff]  ;;  %v1585_v6 = vld [vmem:[#allocation2 + $0xa8] sm:$0xff] }
  0x48   :  { %v340_v7 = vld [vmem:[#allocation5 + $0xf0] sm:$0xff]  ;;  %v341_v8 = vld [vmem:[#allocation5 + $0xf8] sm:$0xff]  ;;  %v1590_v10 = vld [vmem:[#allocation2 + $0xb0] sm:$0xff] }
  0x49   :  { %1172 = vmatpush3.bf16.msra.mxu1 %v1171_v36  ;;  %v1183_v9 = vpack.c.bf16 %v341_v8, %v340_v7  ;;  %v1596_v11 = vld [vmem:[#allocation2 + $0xb8] sm:$0xff]  ;;  %v1601_v12 = vld [vmem:[#allocation2 + $0xc0] sm:$0xff]  ;;  %v565_v13 = vld [vmem:[#allocation7] sm:$0xff] }
  0x4a   :  { %1151 = vmatpush3.bf16.msra.mxu0 %v1150_v20  ;;  %1173 = vmatprep.subr.bf16.mxu1 %v1373_v0  ;;  %v566_v14 = vld [vmem:[#allocation7 + $0x8] sm:$0xff]  ;;  %v567_v15 = vld [vmem:[#allocation7 + $0x10] sm:$0xff]  ;;  %v568_v17 = vld [vmem:[#allocation7 + $0x18] sm:$0xff] }
  0x4b   :  { %1152 = vmatprep.subr.bf16.mxu0 %v1373_v0  ;;  %v1186_v16 = vpack.c.bf16 %v566_v14, %v565_v13  ;;  %v1189_v18 = vpack.c.bf16 %v568_v17, %v567_v15  ;;  %v569_v19 = vld [vmem:[#allocation7 + $0x20] sm:$0xff]  ;;  %v570_v20 = vld [vmem:[#allocation7 + $0x28] sm:$0xff]  ;;  %v571_v22 = vld [vmem:[#allocation7 + $0x30] sm:$0xff] }
  0x4c   :  { %v1606_v21 = vpack.c.bf16 %v570_v20, %v569_v19  ;;  %v572_v23 = vld [vmem:[#allocation7 + $0x38] sm:$0xff]  ;;  %v573_v25 = vld [vmem:[#allocation7 + $0x40] sm:$0xff]  ;;  %v574_v26 = vld [vmem:[#allocation7 + $0x48] sm:$0xff] }
  0x4d   :  { %1175 = vmatpush3.bf16.msra.mxu1 %v1174_v40  ;;  %v1610_v24 = vpack.c.bf16 %v572_v23, %v571_v22  ;;  %v575_v28 = vld [vmem:[#allocation7 + $0x50] sm:$0xff]  ;;  %v576_v29 = vld [vmem:[#allocation7 + $0x58] sm:$0xff]  ;;  %v577_v31 = vld [vmem:[#allocation7 + $0x60] sm:$0xff] }
  0x4e   :  { %1154 = vmatpush3.bf16.msra.mxu0 %v1153_v27  ;;  %1176 = vmatprep.subr.bf16.mxu1 %v1373_v0  ;;  %v1614_v27 = vpack.c.bf16 %v574_v26, %v573_v25  ;;  %v1618_v30 = vpack.c.bf16 %v576_v29, %v575_v28  ;;  %v578_v32 = vld [vmem:[#allocation7 + $0x68] sm:$0xff]  ;;  %v579_v34 = vld [vmem:[#allocation7 + $0x70] sm:$0xff]  ;;  %v580_v35 = vld [vmem:[#allocation7 + $0x78] sm:$0xff] }
  0x4f   :  { %1155 = vmatprep.subr.bf16.mxu0 %v1373_v0  ;;  %v1628_v36 = vld [vmem:[%s1866_s2] ss:$0 sm:$0xff]  ;;  %v1631_v38 = vpack.c.bf16 %v580_v35, %v579_v34  ;;  %v581_v41 = vld [vmem:[#allocation7 + $0x80] sm:$0xff]  ;;  %v582_v42 = vld [vmem:[#allocation7 + $0x88] sm:$0xff] }
  0x50   :  { %v1636_v45 = vpack.c.bf16 %v582_v42, %v581_v41  ;;  %v583_v7 = vld [vmem:[#allocation7 + $0x90] sm:$0xff]  ;;  %v584_v8 = vld [vmem:[#allocation7 + $0x98] sm:$0xff]  ;;  %v585_v19 = vld [vmem:[#allocation7 + $0xa0] sm:$0xff] }
  0x51   :  { %1178 = vmatpush3.bf16.msra.mxu1 %v1177_v44  ;;  %v1644_v14 = vpack.c.bf16 %v584_v8, %v583_v7  ;;  %v586_v20 = vld [vmem:[#allocation7 + $0xa8] sm:$0xff]  ;;  %v587_v28 = vld [vmem:[#allocation7 + $0xb0] sm:$0xff]  ;;  %v588_v29 = vld [vmem:[#allocation7 + $0xb8] sm:$0xff] }
  0x52   :  { %1157 = vmatpush3.bf16.msra.mxu0 %v1156_v33  ;;  %1179 = vmatprep.subr.bf16.mxu1 %v1373_v0  ;;  %v1622_v33 = vpack.c.bf16 %v578_v32, %v577_v31  ;;  %v1652_v23 = vpack.c.bf16 %v586_v20, %v585_v19  ;;  %v1661_v32 = vpack.c.bf16 %v588_v29, %v587_v28 }
  0x53   :  { %1158 = vmatprep.subr.bf16.mxu0 %v1373_v0 }
  0x55   :  { %1181 = vmatpush3.bf16.msra.mxu1 %v1180_v48 }
  0x56   :  { %1160 = vmatpush3.bf16.msra.mxu0 %v1159_v39  ;;  %1182 = vmatprep.subr.bf16.mxu1 %v1373_v0 }
  0x57   :  { %1185 = vmatprep.subr.bf16.mxu0 %v1373_v0 }
  0x59   :  { %956 = vmatmul.mubr.f32.vlgmr.msra.gmra.mrb[0].mxu0 %v1476_v43  ;;  %1184 = vmatpush3.bf16.msra.mxu1 %v1183_v9 }
  0x5a   :  { %958 = vmatprep.mubr.msk.f32.mxu0 %vm1374_vm0, %v1375_v1  ;;  %1233 = vmatprep.subr.bf16.mxu1 %v1373_v0 }
  0x5b   :  { %1187 = vmatpush1.bf16.msra.mxu0 %v1186_v16 }
  0x5c   :  { %1188 = vmatprep.subr.bf16.mxu0 %v1373_v0 }
  0x5d   :  { %959 = vmatmul.mubr.f32.gmra.mrb[2].mxu0 %v1483_v47 }
  0x5e   :  { %961 = vmatprep.mubr.msk.f32.mxu0 %vm1374_vm0, %v1375_v1 }
  0x5f   :  { %1190 = vmatpush1.bf16.msra.mxu0 %v1189_v18 }
  0x60   :  { %1191 = vmatprep.subr.bf16.mxu0 %v1373_v0 }
  0x61   :  { %962 = vmatmul.mubr.f32.gmra.mrb[4].mxu0 %v1489_v49 }
  0x62   :  { %964 = vmatprep.mubr.msk.f32.mxu0 %vm1374_vm0, %v1375_v1 }
  0x63   :  { %1193 = vmatpush1.bf16.msra.mxu0 %v1606_v21 }
  0x64   :  { %1194 = vmatprep.subr.bf16.mxu0 %v1373_v0 }
  0x65   :  { %965 = vmatmul.mubr.f32.gmra.mrb[6].mxu0 %v1495_v50 }
  0x66   :  { %967 = vmatprep.mubr.msk.f32.mxu0 %vm1374_vm0, %v1375_v1 }
  0x67   :  { %1196 = vmatpush1.bf16.msra.mxu0 %v1610_v24 }
  0x68   :  { %1197 = vmatprep.subr.bf16.mxu0 %v1373_v0 }
  0x69   :  { %968 = vmatmul.mubr.f32.gmra.mrb[8].mxu0 %v1500_v51 }
  0x6a   :  { %970 = vmatprep.mubr.msk.f32.mxu0 %vm1374_vm0, %v1375_v1 }
  0x6b   :  { %1199 = vmatpush1.bf16.msra.mxu0 %v1614_v27 }
  0x6c   :  { %1200 = vmatprep.subr.bf16.mxu0 %v1373_v0 }
  0x6d   :  { %971 = vmatmul.mubr.f32.gmra.mrb[10].mxu0 %v1505_v52 }
  0x6e   :  { %973 = vmatprep.mubr.msk.f32.mxu0 %vm1374_vm0, %v1375_v1 }
  0x6f   :  { %1202 = vmatpush1.bf16.msra.mxu0 %v1618_v30 }
  0x70   :  { %1203 = vmatprep.subr.bf16.mxu0 %v1373_v0 }
  0x71   :  { %974 = vmatmul.mubr.f32.gmra.mrb[12].mxu0 %v1510_v53 }
  0x72   :  { %976 = vmatprep.mubr.msk.f32.mxu0 %vm1374_vm0, %v1375_v1 }
  0x73   :  { %1205 = vmatpush1.bf16.msra.mxu0 %v1622_v33 }
  0x74   :  { %1206 = vmatprep.subr.bf16.mxu0 %v1373_v0 }
  0x75   :  { %977 = vmatmul.mubr.f32.gmra.mrb[14].mxu0 %v1515_v54 }
  0x76   :  { %979 = vmatprep.mubr.msk.f32.mxu0 %vm1374_vm0, %v1375_v1 }
  0x77   :  { %1208 = vmatpush1.bf16.msra.mxu0 %v1631_v38 }
  0x78   :  { %1209 = vmatprep.subr.bf16.mxu0 %v1373_v0 }
  0x79   :  { %980 = vmatmul.mubr.f32.gmra.mrb[16].mxu0 %v1520_v55 }
  0x7a   :  { %982 = vmatprep.mubr.msk.f32.mxu0 %vm1374_vm0, %v1375_v1 }
  0x7b   :  { %1211 = vmatpush1.bf16.msra.mxu0 %v1636_v45 }
  0x7c   :  { %1212 = vmatprep.subr.bf16.mxu0 %v1373_v0 }
  0x7d   :  { %983 = vmatmul.mubr.f32.gmra.mrb[18].mxu0 %v1525_v56 }
  0x7e   :  { %985 = vmatprep.mubr.msk.f32.mxu0 %vm1374_vm0, %v1375_v1 }
  0x7f   :  { %1214 = vmatpush1.bf16.msra.mxu0 %v1644_v14 }
  0x80   :  { %1215 = vmatprep.subr.bf16.mxu0 %v1373_v0 }
  0x81   :  { %986 = vmatmul.mubr.f32.gmra.mrb[20].mxu0 %v1530_v57 }
  0x82   :  { %988 = vmatprep.mubr.msk.f32.mxu0 %vm1374_vm0, %v1375_v1 }
  0x83   :  { %1217 = vmatpush1.bf16.msra.mxu0 %v1652_v23 }
  0x84   :  { %1218 = vmatprep.subr.bf16.mxu0 %v1373_v0 }
  0x85   :  { %989 = vmatmul.mubr.f32.gmra.mrb[22].mxu0 %v1535_v58 }
  0x86   :  { %991 = vmatprep.mubr.msk.f32.mxu0 %vm1374_vm0, %v1375_v1 }
  0x87   :  { %1220 = vmatpush1.bf16.msra.mxu0 %v1661_v32 }
  0x88   :  { %1221 = vmatprep.subr.bf16.mxu0 %v1373_v0 }
  0x89   :  { %992 = vmatmul.mubr.f32.gmra.mrb[24].mxu0 %v1540_v59 }
  0x8a   :  { %994 = vmatprep.mubr.msk.f32.mxu0 %vm1374_vm0, %v1375_v1 }
  0x8d   :  { %995 = vmatmul.mubr.f32.gmra.mrb[26].mxu0 %v1545_v60 }
  0x8e   :  { %997 = vmatprep.mubr.msk.f32.mxu0 %vm1374_vm0, %v1375_v1 }
  0x91   :  { %998 = vmatmul.mubr.f32.gmra.mrb[28].mxu0 %v1550_v61 }
  0x92   :  { %1000 = vmatprep.mubr.msk.f32.mxu0 %vm1374_vm0, %v1375_v1 }
  0x95   :  { %1001 = vmatmul.mubr.f32.gmra.mrb[30].mxu0 %v1555_v62 }
  0x96   :  { %1003 = vmatprep.mubr.msk.f32.mxu0 %vm1374_vm0, %v1375_v1 }
  0x99   :  { %1004 = vmatmul.mubr.f32.gmra.mrb[32].mxu0 %v1560_v63 }
  0x9a   :  { %1006 = vmatprep.mubr.msk.f32.mxu0 %vm1374_vm0, %v1375_v1 }
  0x9d   :  { %1007 = vmatmul.mubr.f32.gmra.mrb[34].mxu0 %v1565_v2 }
  0x9e   :  { %1009 = vmatprep.mubr.msk.f32.mxu0 %vm1374_vm0, %v1375_v1 }
  0xa1   :  { %1010 = vmatmul.mubr.f32.gmra.mrb[36].mxu0 %v1570_v3 }
  0xa2   :  { %1012 = vmatprep.mubr.msk.f32.mxu0 %vm1374_vm0, %v1375_v1 }
  0xa5   :  { %1013 = vmatmul.mubr.f32.gmra.mrb[38].mxu0 %v1575_v4 }
  0xa6   :  { %1015 = vmatprep.mubr.msk.f32.mxu0 %vm1374_vm0, %v1375_v1 }
  0xa9   :  { %1016 = vmatmul.mubr.f32.gmra.mrb[40].mxu0 %v1580_v5 }
  0xaa   :  { %1018 = vmatprep.mubr.msk.f32.mxu0 %vm1374_vm0, %v1375_v1 }
  0xad   :  { %1019 = vmatmul.mubr.f32.gmra.mrb[42].mxu0 %v1585_v6 }
  0xae   :  { %1021 = vmatprep.mubr.msk.f32.mxu0 %vm1374_vm0, %v1375_v1 }
  0xb1   :  { %1022 = vmatmul.mubr.f32.gmra.mrb[44].mxu0 %v1590_v10 }
  0xb2   :  { %1024 = vmatprep.mubr.msk.f32.mxu0 %vm1374_vm0, %v1375_v1 }
  0xb5   :  { %1025 = vmatmul.mubr.f32.gmra.mrb[46].mxu0 %v1596_v11 }
  0xb6   :  { %1027 = vmatprep.mubr.msk.f32.mxu0 %vm1374_vm0, %v1375_v1 }
  0xb9   :  { %1028 = vmatmul.mubr.f32.gmra.mrb[48].mxu0 %v1601_v12 }
  0xba   :  { %668 = vmatprep.mubr.f32.mxu0 %v1476_v43 }
 0x12c   :  { %v176_v37 = vpop.f32.mrb[0].mxu0 }
 0x12d   :  { %v177_v39 = vadd.f32 %v1628_v36, %v176_v37  ;;  %v957_v40 = vpop.f32.mrb[1].mxu0  ;;  %v589_v37 = vld [vmem:[#allocation7 + $0xc0] sm:$0xff] }
 0x12f   :  { %v300_v43 = vmax.f32 %v177_v39, 0.0  ;;  %v590_v39 = vld [vmem:[#allocation7 + $0xc8] sm:$0xff] }
 0x130   :  { %v181_v44 = vpop.f32.mrb[2].mxu0  ;;  %v1670_v41 = vpack.c.bf16 %v590_v39, %v589_v37 }
 0x131   :  { %v182_v46 = vadd.f32 %v1628_v36, %v181_v44  ;;  %v960_v48 = vpop.f32.mrb[3].mxu0  ;;  %1063 = vmatmul.mubr.f32.vlgmr.msra.gmra.mrb[0].mxu1 %v300_v43  ;;  %v591_v44 = vld [vmem:[#allocation7 + $0xd0] sm:$0xff] }
 0x132   :  { %1065 = vmatprep.mubr.msk.f32.mxu1 %vm1374_vm0, %v1375_v1  ;;  %1249 = vmatpush1.bf16.msra.mxu1 %v1186_v16 }
 0x133   :  { %v301_v9 = vmax.f32 %v182_v46, 0.0  ;;  %1234 = vmatprep.subr.bf16.mxu1 %v1373_v0  ;;  %v592_v46 = vld [vmem:[#allocation7 + $0xd8] sm:$0xff]  ;;  %1223 = vmatpush1.bf16.msra.mxu0 %v1670_v41 }
 0x134   :  { %v186_v13 = vpop.f32.mrb[4].mxu0  ;;  %v1679_v7 = vpack.c.bf16 %v592_v46, %v591_v44  ;;  %1224 = vmatprep.subr.bf16.mxu0 %v1373_v0 }
 0x135   :  { %v187_v15 = vadd.f32 %v1628_v36, %v186_v13  ;;  %v963_v17 = vpop.f32.mrb[5].mxu0  ;;  %1066 = vmatmul.mubr.f32.gmra.mrb[2].mxu1 %v301_v9  ;;  %v593_v13 = vld [vmem:[#allocation7 + $0xe0] sm:$0xff] }
 0x136   :  { %1068 = vmatprep.mubr.msk.f32.mxu1 %vm1374_vm0, %v1375_v1  ;;  %1250 = vmatpush1.bf16.msra.mxu1 %v1189_v18 }
 0x137   :  { %v302_v16 = vmax.f32 %v187_v15, 0.0  ;;  %1235 = vmatprep.subr.bf16.mxu1 %v1373_v0  ;;  %v594_v15 = vld [vmem:[#allocation7 + $0xe8] sm:$0xff]  ;;  %1226 = vmatpush1.bf16.msra.mxu0 %v1679_v7 }
 0x138   :  { %v191_v22 = vpop.f32.mrb[6].mxu0  ;;  %v1688_v19 = vpack.c.bf16 %v594_v15, %v593_v13  ;;  %1227 = vmatprep.subr.bf16.mxu0 %v1373_v0 }
 0x139   :  { %v192_v25 = vadd.f32 %v1628_v36, %v191_v22  ;;  %v966_v26 = vpop.f32.mrb[7].mxu0  ;;  %1069 = vmatmul.mubr.f32.gmra.mrb[4].mxu1 %v302_v16 }
 0x13a   :  { %1071 = vmatprep.mubr.msk.f32.mxu1 %vm1374_vm0, %v1375_v1  ;;  %1251 = vmatpush1.bf16.msra.mxu1 %v1606_v21 }
 0x13b   :  { %v303_v18 = vmax.f32 %v192_v25, 0.0  ;;  %1236 = vmatprep.subr.bf16.mxu1 %v1373_v0  ;;  %1229 = vmatpush1.bf16.msra.mxu0 %v1688_v19 }
 0x13c   :  { %v196_v31 = vpop.f32.mrb[8].mxu0  ;;  %1230 = vmatprep.subr.bf16.mxu0 %v1373_v0 }
 0x13d   :  { %v197_v34 = vadd.f32 %v1628_v36, %v196_v31  ;;  %v969_v35 = vpop.f32.mrb[9].mxu0  ;;  %1072 = vmatmul.mubr.f32.gmra.mrb[6].mxu1 %v303_v18 }
 0x13e   :  { %1074 = vmatprep.mubr.msk.f32.mxu1 %vm1374_vm0, %v1375_v1  ;;  %1252 = vmatpush1.bf16.msra.mxu1 %v1610_v24 }
 0x13f   :  { %v304_v21 = vmax.f32 %v197_v34, 0.0  ;;  %1237 = vmatprep.subr.bf16.mxu1 %v1373_v0 }
 0x140   :  { %v201_v40 = vpop.f32.mrb[10].mxu0 }
 0x141   :  { %v202_v42 = vadd.f32 %v1628_v36, %v201_v40  ;;  %v972_v43 = vpop.f32.mrb[11].mxu0  ;;  %1075 = vmatmul.mubr.f32.gmra.mrb[8].mxu1 %v304_v21 }
 0x142   :  { %1077 = vmatprep.mubr.msk.f32.mxu1 %vm1374_vm0, %v1375_v1  ;;  %1253 = vmatpush1.bf16.msra.mxu1 %v1614_v27 }
 0x143   :  { %v305_v24 = vmax.f32 %v202_v42, 0.0  ;;  %1238 = vmatprep.subr.bf16.mxu1 %v1373_v0 }
 0x144   :  { %v206_v48 = vpop.f32.mrb[12].mxu0 }
 0x145   :  { %v207_v8 = vadd.f32 %v1628_v36, %v206_v48  ;;  %v975_v9 = vpop.f32.mrb[13].mxu0  ;;  %1078 = vmatmul.mubr.f32.gmra.mrb[10].mxu1 %v305_v24 }
 0x146   :  { %1080 = vmatprep.mubr.msk.f32.mxu1 %vm1374_vm0, %v1375_v1  ;;  %1254 = vmatpush1.bf16.msra.mxu1 %v1618_v30 }
 0x147   :  { %v306_v27 = vmax.f32 %v207_v8, 0.0  ;;  %1239 = vmatprep.subr.bf16.mxu1 %v1373_v0 }
 0x148   :  { %v211_v17 = vpop.f32.mrb[14].mxu0 }
 0x149   :  { %v212_v20 = vadd.f32 %v1628_v36, %v211_v17  ;;  %v978_v16 = vpop.f32.mrb[15].mxu0  ;;  %1081 = vmatmul.mubr.f32.gmra.mrb[12].mxu1 %v306_v27 }
 0x14a   :  { %1083 = vmatprep.mubr.msk.f32.mxu1 %vm1374_vm0, %v1375_v1  ;;  %1255 = vmatpush1.bf16.msra.mxu1 %v1622_v33 }
 0x14b   :  { %v307_v30 = vmax.f32 %v212_v20, 0.0  ;;  %1240 = vmatprep.subr.bf16.mxu1 %v1373_v0 }
 0x14c   :  { %v216_v22 = vpop.f32.mrb[16].mxu0 }
 0x14d   :  { %v217_v25 = vadd.f32 %v1628_v36, %v216_v22  ;;  %v981_v26 = vpop.f32.mrb[17].mxu0  ;;  %1084 = vmatmul.mubr.f32.gmra.mrb[14].mxu1 %v307_v30 }
 0x14e   :  { %1086 = vmatprep.mubr.msk.f32.mxu1 %vm1374_vm0, %v1375_v1  ;;  %1256 = vmatpush1.bf16.msra.mxu1 %v1631_v38 }
 0x14f   :  { %v308_v28 = vmax.f32 %v217_v25, 0.0  ;;  %1241 = vmatprep.subr.bf16.mxu1 %v1373_v0 }
 0x150   :  { %v221_v33 = vpop.f32.mrb[18].mxu0 }
 0x151   :  { %v222_v29 = vadd.f32 %v1628_v36, %v221_v33  ;;  %v984_v18 = vpop.f32.mrb[19].mxu0  ;;  %1087 = vmatmul.mubr.f32.gmra.mrb[16].mxu1 %v308_v28 }
 0x152   :  { %1089 = vmatprep.mubr.msk.f32.mxu1 %vm1374_vm0, %v1375_v1  ;;  %1257 = vmatpush1.bf16.msra.mxu1 %v1636_v45 }
 0x153   :  { %v309_v31 = vmax.f32 %v222_v29, 0.0  ;;  %1242 = vmatprep.subr.bf16.mxu1 %v1373_v0 }
 0x154   :  { %v226_v34 = vpop.f32.mrb[20].mxu0 }
 0x155   :  { %v227_v35 = vadd.f32 %v1628_v36, %v226_v34  ;;  %v987_v38 = vpop.f32.mrb[21].mxu0  ;;  %1090 = vmatmul.mubr.f32.gmra.mrb[18].mxu1 %v309_v31 }
 0x156   :  { %1092 = vmatprep.mubr.msk.f32.mxu1 %vm1374_vm0, %v1375_v1  ;;  %1258 = vmatpush1.bf16.msra.mxu1 %v1644_v14 }
 0x157   :  { %v310_v37 = vmax.f32 %v227_v35, 0.0  ;;  %1243 = vmatprep.subr.bf16.mxu1 %v1373_v0 }
 0x158   :  { %v231_v39 = vpop.f32.mrb[22].mxu0 }
 0x159   :  { %v232_v21 = vadd.f32 %v1628_v36, %v231_v39  ;;  %v990_v45 = vpop.f32.mrb[23].mxu0  ;;  %1093 = vmatmul.mubr.f32.gmra.mrb[20].mxu1 %v310_v37 }
 0x15a   :  { %1095 = vmatprep.mubr.msk.f32.mxu1 %vm1374_vm0, %v1375_v1  ;;  %1259 = vmatpush1.bf16.msra.mxu1 %v1652_v23 }
 0x15b   :  { %v311_v40 = vmax.f32 %v232_v21, 0.0  ;;  %1244 = vmatprep.subr.bf16.mxu1 %v1373_v0 }
 0x15c   :  { %v236_v42 = vpop.f32.mrb[24].mxu0 }
 0x15d   :  { %v237_v43 = vadd.f32 %v1628_v36, %v236_v42  ;;  %v993_v14 = vpop.f32.mrb[25].mxu0  ;;  %1096 = vmatmul.mubr.f32.gmra.mrb[22].mxu1 %v311_v40 }
 0x15e   :  { %1098 = vmatprep.mubr.msk.f32.mxu1 %vm1374_vm0, %v1375_v1  ;;  %1260 = vmatpush1.bf16.msra.mxu1 %v1661_v32  ;;  %v595_v14 = vld [vmem:[#allocation7 + $0xf0] sm:$0xff] }
 0x15f   :  { %v312_v44 = vmax.f32 %v237_v43, 0.0  ;;  %1245 = vmatprep.subr.bf16.mxu1 %v1373_v0 }
 0x160   :  { %v241_v46 = vpop.f32.mrb[26].mxu0 }
 0x161   :  { %v242_v24 = vadd.f32 %v1628_v36, %v241_v46  ;;  %v996_v23 = vpop.f32.mrb[27].mxu0  ;;  %1099 = vmatmul.mubr.f32.gmra.mrb[24].mxu1 %v312_v44  ;;  %v596_v44 = vld [vmem:[#allocation7 + $0xf8] sm:$0xff] }
 0x162   :  { %1101 = vmatprep.mubr.msk.f32.mxu1 %vm1374_vm0, %v1375_v1  ;;  %1261 = vmatpush1.bf16.msra.mxu1 %v1670_v41 }
 0x163   :  { %v313_v48 = vmax.f32 %v242_v24, 0.0  ;;  %1246 = vmatprep.subr.bf16.mxu1 %v1373_v0  ;;  %v1231_v24 = vpack.c.bf16 %v596_v44, %v595_v14 }
 0x164   :  { %v246_v8 = vpop.f32.mrb[28].mxu0 }
 0x165   :  { %v247_v9 = vadd.f32 %v1628_v36, %v246_v8  ;;  %v999_v32 = vpop.f32.mrb[29].mxu0  ;;  %1102 = vmatmul.mubr.f32.gmra.mrb[26].mxu1 %v313_v48  ;;  %1232 = vmatpush1.bf16.msra.mxu0 %v1231_v24 }
 0x166   :  { %1104 = vmatprep.mubr.msk.f32.mxu1 %vm1374_vm0, %v1375_v1  ;;  %1262 = vmatpush1.bf16.msra.mxu1 %v1679_v7 }
 0x167   :  { %v314_v13 = vmax.f32 %v247_v9, 0.0  ;;  %1247 = vmatprep.subr.bf16.mxu1 %v1373_v0 }
 0x168   :  { %v251_v15 = vpop.f32.mrb[30].mxu0 }
 0x169   :  { %v252_v27 = vadd.f32 %v1628_v36, %v251_v15  ;;  %v1002_v41 = vpop.f32.mrb[31].mxu0  ;;  %1105 = vmatmul.mubr.f32.gmra.mrb[28].mxu1 %v314_v13 }
 0x16a   :  { %1107 = vmatprep.mubr.msk.f32.mxu1 %vm1374_vm0, %v1375_v1  ;;  %1263 = vmatpush1.bf16.msra.mxu1 %v1688_v19 }
 0x16b   :  { %v315_v17 = vmax.f32 %v252_v27, 0.0  ;;  %1248 = vmatprep.subr.bf16.mxu1 %v1373_v0 }
 0x16c   :  { %v256_v20 = vpop.f32.mrb[32].mxu0 }
 0x16d   :  { %v257_v16 = vadd.f32 %v1628_v36, %v256_v20  ;;  %v1005_v7 = vpop.f32.mrb[33].mxu0  ;;  %1108 = vmatmul.mubr.f32.gmra.mrb[30].mxu1 %v315_v17 }
 0x16e   :  { %1110 = vmatprep.mubr.msk.f32.mxu1 %vm1374_vm0, %v1375_v1  ;;  %1264 = vmatpush1.bf16.msra.mxu1 %v1231_v24 }
 0x16f   :  { %v316_v30 = vmax.f32 %v257_v16, 0.0  ;;  %v1769_v16 = vld [vmem:[%s1866_s2 + $0x1] ss:$0 sm:$0xff] }
 0x170   :  { %v261_v22 = vpop.f32.mrb[34].mxu0 }
 0x171   :  { %v262_v25 = vadd.f32 %v1628_v36, %v261_v22  ;;  %v1008_v26 = vpop.f32.mrb[35].mxu0  ;;  %1111 = vmatmul.mubr.f32.gmra.mrb[32].mxu1 %v316_v30 }
 0x172   :  { %1113 = vmatprep.mubr.msk.f32.mxu1 %vm1374_vm0, %v1375_v1 }
 0x173   :  { %v317_v19 = vmax.f32 %v262_v25, 0.0 }
 0x174   :  { %v266_v28 = vpop.f32.mrb[36].mxu0 }
 0x175   :  { %v267_v0 = vadd.f32 %v1628_v36, %v266_v28  ;;  %v1011_v33 = vpop.f32.mrb[37].mxu0  ;;  %1114 = vmatmul.mubr.f32.gmra.mrb[34].mxu1 %v317_v19 }
 0x176   :  { %1116 = vmatprep.mubr.msk.f32.mxu1 %vm1374_vm0, %v1375_v1 }
 0x177   :  { %v318_v29 = vmax.f32 %v267_v0, 0.0 }
 0x178   :  { %v271_v18 = vpop.f32.mrb[38].mxu0 }
 0x179   :  { %v272_v31 = vadd.f32 %v1628_v36, %v271_v18  ;;  %v1014_v34 = vpop.f32.mrb[39].mxu0  ;;  %1117 = vmatmul.mubr.f32.gmra.mrb[36].mxu1 %v318_v29 }
 0x17a   :  { %1119 = vmatprep.mubr.msk.f32.mxu1 %vm1374_vm0, %v1375_v1 }
 0x17b   :  { %v319_v35 = vmax.f32 %v272_v31, 0.0 }
 0x17c   :  { %v276_v38 = vpop.f32.mrb[40].mxu0 }
 0x17d   :  { %v277_v37 = vadd.f32 %v1628_v36, %v276_v38  ;;  %v1017_v39 = vpop.f32.mrb[41].mxu0  ;;  %1120 = vmatmul.mubr.f32.gmra.mrb[38].mxu1 %v319_v35 }
 0x17e   :  { %1122 = vmatprep.mubr.msk.f32.mxu1 %vm1374_vm0, %v1375_v1 }
 0x17f   :  { %v320_v21 = vmax.f32 %v277_v37, 0.0 }
 0x180   :  { %v281_v45 = vpop.f32.mrb[42].mxu0 }
 0x181   :  { %v282_v40 = vadd.f32 %v1628_v36, %v281_v45  ;;  %v1020_v42 = vpop.f32.mrb[43].mxu0  ;;  %1123 = vmatmul.mubr.f32.gmra.mrb[40].mxu1 %v320_v21 }
 0x182   :  { %1125 = vmatprep.mubr.msk.f32.mxu1 %vm1374_vm0, %v1375_v1 }
 0x183   :  { %v321_v43 = vmax.f32 %v282_v40, 0.0 }
 0x184   :  { %v286_v46 = vpop.f32.mrb[44].mxu0 }
 0x185   :  { %v287_v23 = vadd.f32 %v1628_v36, %v286_v46  ;;  %v1023_v48 = vpop.f32.mrb[45].mxu0  ;;  %1126 = vmatmul.mubr.f32.gmra.mrb[42].mxu1 %v321_v43 }
 0x186   :  { %1128 = vmatprep.mubr.msk.f32.mxu1 %vm1374_vm0, %v1375_v1 }
 0x187   :  { %v322_v8 = vmax.f32 %v287_v23, 0.0 }
 0x188   :  { %v291_v9 = vpop.f32.mrb[46].mxu0 }
 0x189   :  { %v292_v32 = vadd.f32 %v1628_v36, %v291_v9  ;;  %v1026_v13 = vpop.f32.mrb[47].mxu0  ;;  %1129 = vmatmul.mubr.f32.gmra.mrb[44].mxu1 %v322_v8 }
 0x18a   :  { %1131 = vmatprep.mubr.msk.f32.mxu1 %vm1374_vm0, %v1375_v1 }
 0x18b   :  { %v323_v15 = vmax.f32 %v292_v32, 0.0 }
 0x18c   :  { %v296_v27 = vpop.f32.mrb[48].mxu0 }
 0x18d   :  { %v297_v41 = vadd.f32 %v1628_v36, %v296_v27  ;;  %v1029_v17 = vpop.f32.mrb[49].mxu0  ;;  %1132 = vmatmul.mubr.f32.gmra.mrb[46].mxu1 %v323_v15 }
 0x18e   :  { %1134 = vmatprep.mubr.msk.f32.mxu1 %vm1374_vm0, %v1375_v1 }
 0x18f   :  { %v324_v20 = vmax.f32 %v297_v41, 0.0 }
 0x191   :  { %1135 = vmatmul.mubr.f32.gmra.mrb[48].mxu1 %v324_v20 }
 0x192   :  { %733 = vmatprep.mubr.f32.mxu1 %v1545_v60 }
 0x204   :  { %v416_v7 = vpop.f32.mrb[0].mxu1 }
 0x205   :  { %v417_v30 = vadd.f32 %v1769_v16, %v416_v7  ;;  %v1064_v22 = vpop.f32.mrb[1].mxu1 }
 0x207   :  { %v540_v25 = vmax.f32 %v417_v30, 0.0 }
 0x208   :  { %v421_v36 = vpop.f32.mrb[2].mxu1 }
 0x209   :  { %v422_v26 = vadd.f32 %v1769_v16, %v421_v36  ;;  %v1067_v19 = vpop.f32.mrb[3].mxu1  ;;  %669 = vmatmul.mubr.f32.vlgmr.msra.gmra.mrb[50].mxu0 %v540_v25 }
 0x20a   :  { %673 = vmatprep.mubr.f32.mxu0 %v1483_v47 }
 0x20b   :  { %v541_v1 = vmax.f32 %v422_v26, 0.0 }
 0x20c   :  { %v426_v28 = vpop.f32.mrb[4].mxu1 }
 0x20d   :  { %v427_v60 = vadd.f32 %v1769_v16, %v426_v28  ;;  %v1070_v0 = vpop.f32.mrb[5].mxu1  ;;  %674 = vmatmul.mubr.f32.gmra.mrb[52].mxu0 %v541_v1 }
 0x20e   :  { %678 = vmatprep.mubr.f32.mxu0 %v1489_v49 }
 0x20f   :  { %v542_v33 = vmax.f32 %v427_v60, 0.0 }
 0x210   :  { %v431_v29 = vpop.f32.mrb[6].mxu1 }
 0x211   :  { %v432_v18 = vadd.f32 %v1769_v16, %v431_v29  ;;  %v1073_v31 = vpop.f32.mrb[7].mxu1  ;;  %679 = vmatmul.mubr.f32.gmra.mrb[54].mxu0 %v542_v33 }
 0x212   :  { %683 = vmatprep.mubr.f32.mxu0 %v1495_v50 }
 0x213   :  { %v543_v34 = vmax.f32 %v432_v18, 0.0 }
 0x214   :  { %v436_v35 = vpop.f32.mrb[8].mxu1 }
 0x215   :  { %v437_v47 = vadd.f32 %v1769_v16, %v436_v35  ;;  %v1076_v38 = vpop.f32.mrb[9].mxu1  ;;  %684 = vmatmul.mubr.f32.gmra.mrb[56].mxu0 %v543_v34 }
 0x216   :  { %688 = vmatprep.mubr.f32.mxu0 %v1500_v51 }
 0x217   :  { %v544_v37 = vmax.f32 %v437_v47, 0.0 }
 0x218   :  { %v441_v39 = vpop.f32.mrb[10].mxu1 }
 0x219   :  { %v442_v49 = vadd.f32 %v1769_v16, %v441_v39  ;;  %v1079_v21 = vpop.f32.mrb[11].mxu1  ;;  %689 = vmatmul.mubr.f32.gmra.mrb[58].mxu0 %v544_v37 }
 0x21a   :  { %693 = vmatprep.mubr.f32.mxu0 %v1505_v52 }
 0x21b   :  { %v545_v45 = vmax.f32 %v442_v49, 0.0 }
 0x21c   :  { %v446_v40 = vpop.f32.mrb[12].mxu1 }
 0x21d   :  { %v447_v50 = vadd.f32 %v1769_v16, %v446_v40  ;;  %v1082_v42 = vpop.f32.mrb[13].mxu1  ;;  %694 = vmatmul.mubr.f32.gmra.mrb[60].mxu0 %v545_v45 }
 0x21e   :  { %698 = vmatprep.mubr.f32.mxu0 %v1510_v53 }
 0x21f   :  { %v546_v43 = vmax.f32 %v447_v50, 0.0 }
 0x220   :  { %v451_v14 = vpop.f32.mrb[14].mxu1 }
 0x221   :  { %v452_v51 = vadd.f32 %v1769_v16, %v451_v14  ;;  %v1085_v44 = vpop.f32.mrb[15].mxu1  ;;  %699 = vmatmul.mubr.f32.gmra.mrb[62].mxu0 %v546_v43 }
 0x222   :  { %703 = vmatprep.mubr.f32.mxu0 %v1515_v54 }
 0x223   :  { %v547_v46 = vmax.f32 %v452_v51, 0.0 }
 0x224   :  { %v456_v24 = vpop.f32.mrb[16].mxu1 }
 0x225   :  { %v457_v52 = vadd.f32 %v1769_v16, %v456_v24  ;;  %v1088_v23 = vpop.f32.mrb[17].mxu1  ;;  %704 = vmatmul.mubr.f32.gmra.mrb[64].mxu0 %v547_v46 }
 0x226   :  { %708 = vmatprep.mubr.f32.mxu0 %v1520_v55 }
 0x227   :  { %v548_v48 = vmax.f32 %v457_v52, 0.0 }
 0x228   :  { %v461_v8 = vpop.f32.mrb[18].mxu1 }
 0x229   :  { %v462_v53 = vadd.f32 %v1769_v16, %v461_v8  ;;  %v1091_v9 = vpop.f32.mrb[19].mxu1  ;;  %709 = vmatmul.mubr.f32.gmra.mrb[66].mxu0 %v548_v48 }
 0x22a   :  { %713 = vmatprep.mubr.f32.mxu0 %v1525_v56 }
 0x22b   :  { %v549_v32 = vmax.f32 %v462_v53, 0.0 }
 0x22c   :  { %v466_v13 = vpop.f32.mrb[20].mxu1 }
 0x22d   :  { %v467_v54 = vadd.f32 %v1769_v16, %v466_v13  ;;  %v1094_v15 = vpop.f32.mrb[21].mxu1  ;;  %714 = vmatmul.mubr.f32.gmra.mrb[68].mxu0 %v549_v32 }
 0x22e   :  { %718 = vmatprep.mubr.f32.mxu0 %v1530_v57 }
 0x22f   :  { %v550_v27 = vmax.f32 %v467_v54, 0.0 }
 0x230   :  { %v471_v41 = vpop.f32.mrb[22].mxu1 }
 0x231   :  { %v472_v55 = vadd.f32 %v1769_v16, %v471_v41  ;;  %v1097_v17 = vpop.f32.mrb[23].mxu1  ;;  %719 = vmatmul.mubr.f32.gmra.mrb[70].mxu0 %v550_v27 }
 0x232   :  { %723 = vmatprep.mubr.f32.mxu0 %v1535_v58 }
 0x233   :  { %v551_v20 = vmax.f32 %v472_v55, 0.0 }
 0x234   :  { %v476_v7 = vpop.f32.mrb[24].mxu1 }
 0x235   :  { %v477_v56 = vadd.f32 %v1769_v16, %v476_v7  ;;  %v1100_v30 = vpop.f32.mrb[25].mxu1  ;;  %724 = vmatmul.mubr.f32.gmra.mrb[72].mxu0 %v551_v20 }
 0x236   :  { %728 = vmatprep.mubr.f32.mxu0 %v1540_v59 }
 0x237   :  { %v552_v22 = vmax.f32 %v477_v56, 0.0 }
 0x238   :  { %v481_v25 = vpop.f32.mrb[26].mxu1 }
 0x239   :  { %v482_v57 = vadd.f32 %v1769_v16, %v481_v25  ;;  %v1103_v36 = vpop.f32.mrb[27].mxu1  ;;  %729 = vmatmul.mubr.f32.gmra.mrb[74].mxu0 %v552_v22 }
 0x23b   :  { %v553_v26 = vmax.f32 %v482_v57, 0.0 }
 0x23c   :  { %v486_v19 = vpop.f32.mrb[28].mxu1 }
 0x23d   :  { %v487_v1 = vadd.f32 %v1769_v16, %v486_v19  ;;  %v1106_v28 = vpop.f32.mrb[29].mxu1  ;;  %734 = vmatmul.mubr.f32.vlgmr.msra.gmra.mrb[50].mxu1 %v553_v26 }
 0x23e   :  { %738 = vmatprep.mubr.f32.mxu1 %v1550_v61 }
 0x23f   :  { %v554_v58 = vmax.f32 %v487_v1, 0.0 }
 0x240   :  { %v491_v60 = vpop.f32.mrb[30].mxu1 }
 0x241   :  { %v492_v0 = vadd.f32 %v1769_v16, %v491_v60  ;;  %v1109_v33 = vpop.f32.mrb[31].mxu1  ;;  %739 = vmatmul.mubr.f32.gmra.mrb[52].mxu1 %v554_v58 }
 0x242   :  { %743 = vmatprep.mubr.f32.mxu1 %v1555_v62 }
 0x243   :  { %v555_v59 = vmax.f32 %v492_v0, 0.0 }
 0x244   :  { %v496_v29 = vpop.f32.mrb[32].mxu1 }
 0x245   :  { %v497_v18 = vadd.f32 %v1769_v16, %v496_v29  ;;  %v1112_v31 = vpop.f32.mrb[33].mxu1  ;;  %744 = vmatmul.mubr.f32.gmra.mrb[54].mxu1 %v555_v59 }
 0x246   :  { %748 = vmatprep.mubr.f32.mxu1 %v1560_v63 }
 0x247   :  { %v556_v34 = vmax.f32 %v497_v18, 0.0 }
 0x248   :  { %v501_v35 = vpop.f32.mrb[34].mxu1 }
 0x249   :  { %v502_v61 = vadd.f32 %v1769_v16, %v501_v35  ;;  %v1115_v47 = vpop.f32.mrb[35].mxu1  ;;  %749 = vmatmul.mubr.f32.gmra.mrb[56].mxu1 %v556_v34 }
 0x24a   :  { %753 = vmatprep.mubr.f32.mxu1 %v1565_v2 }
 0x24b   :  { %v557_v38 = vmax.f32 %v502_v61, 0.0 }
 0x24c   :  { %v506_v37 = vpop.f32.mrb[36].mxu1 }
 0x24d   :  { %v507_v62 = vadd.f32 %v1769_v16, %v506_v37  ;;  %v1118_v39 = vpop.f32.mrb[37].mxu1  ;;  %754 = vmatmul.mubr.f32.gmra.mrb[58].mxu1 %v557_v38 }
 0x24e   :  { %758 = vmatprep.mubr.f32.mxu1 %v1570_v3 }
 0x24f   :  { %v558_v49 = vmax.f32 %v507_v62, 0.0 }
 0x250   :  { %v511_v21 = vpop.f32.mrb[38].mxu1 }
 0x251   :  { %v512_v63 = vadd.f32 %v1769_v16, %v511_v21  ;;  %v1121_v45 = vpop.f32.mrb[39].mxu1  ;;  %759 = vmatmul.mubr.f32.gmra.mrb[60].mxu1 %v558_v49 }
 0x252   :  { %763 = vmatprep.mubr.f32.mxu1 %v1575_v4 }
 0x253   :  { %v559_v40 = vmax.f32 %v512_v63, 0.0 }
 0x254   :  { %v516_v50 = vpop.f32.mrb[40].mxu1 }
 0x255   :  { %v517_v2 = vadd.f32 %v1769_v16, %v516_v50  ;;  %v1124_v42 = vpop.f32.mrb[41].mxu1  ;;  %764 = vmatmul.mubr.f32.gmra.mrb[62].mxu1 %v559_v40 }
 0x256   :  { %768 = vmatprep.mubr.f32.mxu1 %v1580_v5 }
 0x257   :  { %v560_v43 = vmax.f32 %v517_v2, 0.0 }
 0x258   :  { %v521_v14 = vpop.f32.mrb[42].mxu1 }
 0x259   :  { %v522_v3 = vadd.f32 %v1769_v16, %v521_v14  ;;  %v1127_v51 = vpop.f32.mrb[43].mxu1  ;;  %769 = vmatmul.mubr.f32.gmra.mrb[64].mxu1 %v560_v43 }
 0x25a   :  { %773 = vmatprep.mubr.f32.mxu1 %v1585_v6 }
 0x25b   :  { %v561_v44 = vmax.f32 %v522_v3, 0.0 }
 0x25c   :  { %v526_v46 = vpop.f32.mrb[44].mxu1 }
 0x25d   :  { %v527_v4 = vadd.f32 %v1769_v16, %v526_v46  ;;  %v1130_v24 = vpop.f32.mrb[45].mxu1  ;;  %774 = vmatmul.mubr.f32.gmra.mrb[66].mxu1 %v561_v44 }
 0x25e   :  { %778 = vmatprep.mubr.f32.mxu1 %v1590_v10  ;;  %v1822_v10 = vld [vmem:[%s1868_s4] ss:$0 sm:$0xff]  ;;  %s1376_s4 = smov [#allocation8]  }
 0x25f   :  { %v562_v52 = vmax.f32 %v527_v4, 0.0  ;;  %s824_s10 = sshll.u32 %s1376_s4, 4  ;;  %s825_s10 = int_to_ptr.vmem [resolvable:$true] %s824_s10 }
 0x260   :  { %v531_v23 = vpop.f32.mrb[46].mxu1  ;;  %s1340_s11 = scalar_lea.vmem %s825_s10, 3200  ;;  %p1345_p11 = scmp.lt.s32.totalorder %s825_s10, %s825_s10 }
 0x261   :  { %v532_v5 = vadd.f32 %v1769_v16, %v531_v23  ;;  %v1133_v48 = vpop.f32.mrb[47].mxu1  ;;  %779 = vmatmul.mubr.f32.gmra.mrb[68].mxu1 %v562_v52  ;;  %p1341_p10 = scmp.ne.s32.totalorder %s825_s10, %s1340_s11  ;;  %p1346_p12 = scmp.lt.s32.totalorder %s1340_s11, %s1340_s11 }
 0x262   :  { %783 = vmatprep.mubr.f32.mxu1 %v1596_v11 }
 0x263   :  { %v563_v8 = vmax.f32 %v532_v5, 0.0  ;;  %p1347_p13 = por %p1346_p12, %p1345_p11 }
 0x264   :  { %v536_v53 = vpop.f32.mrb[48].mxu1 }
 0x265   :  { %v537_v6 = vadd.f32 %v1769_v16, %v536_v53  ;;  %v1136_v9 = vpop.f32.mrb[49].mxu1  ;;  %784 = vmatmul.mubr.f32.gmra.mrb[70].mxu1 %v563_v8  ;;  %p1348_p0 = pnand %p1347_p13, %p1341_p10 }
 0x266   :  { %788 = vmatprep.mubr.f32.mxu1 %v1601_v12 }
 0x267   :  { %v564_v32 = vmax.f32 %v537_v6, 0.0 }
 0x269   :  { %789 = vmatmul.mubr.f32.gmra.mrb[72].mxu1 %v564_v32 }
 0x2dc   :  { %v670_v13 = vpop.f32.mrb[50].mxu0 }
 0x2dd   :  { %v671_v54 = vadd.f32 %v1822_v10, %v670_v13  ;;  %v672_v15 = vpop.f32.mrb[51].mxu0 }
 0x2df   :  { %794 = vst [vmem:[#allocation8] sm:$0xff] %v671_v54 }
 0x2e0   :  { %v675_v11 = vpop.f32.mrb[52].mxu0 }
 0x2e1   :  { %v676_v27 = vadd.f32 %v1822_v10, %v675_v11  ;;  %v677_v16 = vpop.f32.mrb[53].mxu0 }
 0x2e3   :  { %795 = vst [vmem:[#allocation8 + $0x8] sm:$0xff] %v676_v27 }
 0x2e4   :  { %v680_v41 = vpop.f32.mrb[54].mxu0 }
 0x2e5   :  { %v681_v12 = vadd.f32 %v1822_v10, %v680_v41  ;;  %v682_v55 = vpop.f32.mrb[55].mxu0 }
 0x2e7   :  { %796 = vst [vmem:[#allocation8 + $0x10] sm:$0xff] %v681_v12 }
 0x2e8   :  { %v685_v17 = vpop.f32.mrb[56].mxu0 }
 0x2e9   :  { %v686_v20 = vadd.f32 %v1822_v10, %v685_v17  ;;  %v687_v7 = vpop.f32.mrb[57].mxu0 }
 0x2eb   :  { %797 = vst [vmem:[#allocation8 + $0x18] sm:$0xff] %v686_v20 }
 0x2ec   :  { %v690_v56 = vpop.f32.mrb[58].mxu0 }
 0x2ed   :  { %v691_v30 = vadd.f32 %v1822_v10, %v690_v56  ;;  %v692_v22 = vpop.f32.mrb[59].mxu0 }
 0x2ef   :  { %798 = vst [vmem:[#allocation8 + $0x20] sm:$0xff] %v691_v30 }
 0x2f0   :  { %v695_v25 = vpop.f32.mrb[60].mxu0 }
 0x2f1   :  { %v696_v57 = vadd.f32 %v1822_v10, %v695_v25  ;;  %v697_v36 = vpop.f32.mrb[61].mxu0 }
 0x2f3   :  { %799 = vst [vmem:[#allocation8 + $0x28] sm:$0xff] %v696_v57 }
 0x2f4   :  { %v700_v26 = vpop.f32.mrb[62].mxu0 }
 0x2f5   :  { %v701_v19 = vadd.f32 %v1822_v10, %v700_v26  ;;  %v702_v1 = vpop.f32.mrb[63].mxu0 }
 0x2f7   :  { %800 = vst [vmem:[#allocation8 + $0x30] sm:$0xff] %v701_v19 }
 0x2f8   :  { %v705_v28 = vpop.f32.mrb[64].mxu0 }
 0x2f9   :  { %v706_v58 = vadd.f32 %v1822_v10, %v705_v28  ;;  %v707_v60 = vpop.f32.mrb[65].mxu0 }
 0x2fb   :  { %801 = vst [vmem:[#allocation8 + $0x38] sm:$0xff] %v706_v58 }
 0x2fc   :  { %v710_v0 = vpop.f32.mrb[66].mxu0 }
 0x2fd   :  { %v711_v33 = vadd.f32 %v1822_v10, %v710_v0  ;;  %v712_v59 = vpop.f32.mrb[67].mxu0 }
 0x2ff   :  { %802 = vst [vmem:[#allocation8 + $0x40] sm:$0xff] %v711_v33 }
 0x300   :  { %v715_v29 = vpop.f32.mrb[68].mxu0 }
 0x301   :  { %v716_v18 = vadd.f32 %v1822_v10, %v715_v29  ;;  %v717_v31 = vpop.f32.mrb[69].mxu0 }
 0x303   :  { %803 = vst [vmem:[#allocation8 + $0x48] sm:$0xff] %v716_v18 }
 0x304   :  { %v720_v34 = vpop.f32.mrb[70].mxu0 }
 0x305   :  { %v721_v35 = vadd.f32 %v1822_v10, %v720_v34  ;;  %v722_v61 = vpop.f32.mrb[71].mxu0 }
 0x307   :  { %804 = vst [vmem:[#allocation8 + $0x50] sm:$0xff] %v721_v35 }
 0x308   :  { %v725_v47 = vpop.f32.mrb[72].mxu0 }
 0x309   :  { %v726_v38 = vadd.f32 %v1822_v10, %v725_v47  ;;  %v727_v37 = vpop.f32.mrb[73].mxu0 }
 0x30b   :  { %805 = vst [vmem:[#allocation8 + $0x58] sm:$0xff] %v726_v38 }
 0x30c   :  { %v730_v62 = vpop.f32.mrb[74].mxu0 }
 0x30d   :  { %v731_v39 = vadd.f32 %v1822_v10, %v730_v62  ;;  %v732_v49 = vpop.f32.mrb[75].mxu0 }
 0x30f   :  { %806 = vst [vmem:[#allocation8 + $0x60] sm:$0xff] %v731_v39 }
 0x310   :  { %v735_v21 = vpop.f32.mrb[50].mxu1 }
 0x311   :  { %v736_v63 = vadd.f32 %v1822_v10, %v735_v21  ;;  %v737_v45 = vpop.f32.mrb[51].mxu1 }
 0x313   :  { %807 = vst [vmem:[#allocation8 + $0x68] sm:$0xff] %v736_v63 }
 0x314   :  { %v740_v40 = vpop.f32.mrb[52].mxu1 }
 0x315   :  { %v741_v50 = vadd.f32 %v1822_v10, %v740_v40  ;;  %v742_v2 = vpop.f32.mrb[53].mxu1 }
 0x317   :  { %808 = vst [vmem:[#allocation8 + $0x70] sm:$0xff] %v741_v50 }
 0x318   :  { %v745_v42 = vpop.f32.mrb[54].mxu1 }
 0x319   :  { %v746_v43 = vadd.f32 %v1822_v10, %v745_v42  ;;  %v747_v14 = vpop.f32.mrb[55].mxu1 }
 0x31b   :  { %809 = vst [vmem:[#allocation8 + $0x78] sm:$0xff] %v746_v43 }
 0x31c   :  { %v750_v3 = vpop.f32.mrb[56].mxu1 }
 0x31d   :  { %v751_v51 = vadd.f32 %v1822_v10, %v750_v3  ;;  %v752_v44 = vpop.f32.mrb[57].mxu1 }
 0x31f   :  { %810 = vst [vmem:[#allocation8 + $0x80] sm:$0xff] %v751_v51 }
 0x320   :  { %v755_v46 = vpop.f32.mrb[58].mxu1 }
 0x321   :  { %v756_v4 = vadd.f32 %v1822_v10, %v755_v46  ;;  %v757_v24 = vpop.f32.mrb[59].mxu1 }
 0x323   :  { %811 = vst [vmem:[#allocation8 + $0x88] sm:$0xff] %v756_v4 }
 0x324   :  { %v760_v52 = vpop.f32.mrb[60].mxu1 }
 0x325   :  { %v761_v23 = vadd.f32 %v1822_v10, %v760_v52  ;;  %v762_v5 = vpop.f32.mrb[61].mxu1 }
 0x327   :  { %812 = vst [vmem:[#allocation8 + $0x90] sm:$0xff] %v761_v23 }
 0x328   :  { %v765_v48 = vpop.f32.mrb[62].mxu1 }
 0x329   :  { %v766_v8 = vadd.f32 %v1822_v10, %v765_v48  ;;  %v767_v53 = vpop.f32.mrb[63].mxu1 }
 0x32b   :  { %813 = vst [vmem:[#allocation8 + $0x98] sm:$0xff] %v766_v8 }
 0x32c   :  { %v770_v6 = vpop.f32.mrb[64].mxu1 }
 0x32d   :  { %v771_v9 = vadd.f32 %v1822_v10, %v770_v6  ;;  %v772_v32 = vpop.f32.mrb[65].mxu1 }
 0x32f   :  { %814 = vst [vmem:[#allocation8 + $0xa0] sm:$0xff] %v771_v9 }
 0x330   :  { %v775_v13 = vpop.f32.mrb[66].mxu1 }
 0x331   :  { %v776_v54 = vadd.f32 %v1822_v10, %v775_v13  ;;  %v777_v15 = vpop.f32.mrb[67].mxu1 }
 0x333   :  { %815 = vst [vmem:[#allocation8 + $0xa8] sm:$0xff] %v776_v54 }
 0x334   :  { %v780_v11 = vpop.f32.mrb[68].mxu1 }
 0x335   :  { %v781_v27 = vadd.f32 %v1822_v10, %v780_v11  ;;  %v782_v16 = vpop.f32.mrb[69].mxu1 }
 0x337   :  { %816 = vst [vmem:[#allocation8 + $0xb0] sm:$0xff] %v781_v27 }
 0x338   :  { %v785_v41 = vpop.f32.mrb[70].mxu1 }
 0x339   :  { %v786_v12 = vadd.f32 %v1822_v10, %v785_v41  ;;  %v787_v55 = vpop.f32.mrb[71].mxu1 }
 0x33b   :  { %817 = vst [vmem:[#allocation8 + $0xb8] sm:$0xff] %v786_v12 }
 0x33c   :  { %v790_v17 = vpop.f32.mrb[72].mxu1 }
 0x33d   :  { %v791_v20 = vadd.f32 %v1822_v10, %v790_v17  ;;  %v792_v7 = vpop.f32.mrb[73].mxu1 }
 0x33f   :  { %818 = vst [vmem:[#allocation8 + $0xc0] sm:$0xff] %v791_v20 }
 0x340   :  { %1351 = shalt.err (!%p1348_p0)
}
 0x341   :  { %s1352_s14 = scalar_lea.hbm %s1869_s5, 3200 }
 0x342   :  { %p1353_p1 = scmp.ne.s32.totalorder %s1869_s5, %s1352_s14  ;;  %p1356_p2 = scmp.lt.u32.totalorder %s1352_s14, %s1869_s5 }
 0x344   :  { %p1358_p3 = pnand %p1356_p2, %p1353_p1 }
 0x346   :  { %1361 = shalt.err (!%p1358_p3)
}
 0x347   :  { %830 = dma.vmem_to_hbm [thread:$0]  %s825_s10, 3200, %s1869_s5, [#allocation4], %s1370_s30, %s1370_s30, %s1371_s6  }
 0x348   :  { %1366 = dma.done.wait [#allocation4], 3200  }
 0x349   :  { %1367 = vsyncadd [#allocation4], 4294964096 }
 0x34a   :  { %834 = vsyncpa [#allocation3], 1 }
 0x34b   :  { %835 = vsyncpa [#allocation6], 1 }
 0x34c   :  { %836 = vsyncpa [#allocation4], 1 }

</bundles_post_ra>
